<compile_context>
chip_gen: v7x
topology: tpu7x:2x2x1
jax: 0.10.0
libtpu: 0.0.40
codegen_flags: <defaults>
</compile_context>

<pallas_src>
import math
import functools

import jax
import jax.numpy as jnp
from jax.experimental import pallas as pl
from jax.experimental.pallas import tpu as pltpu

LANE = 128


def _pad_to(n, m):
    return ((n + m - 1) // m) * m


def _masked_layernorm(x, w, b, lane_mask, true_dim, eps=1e-5):
    """LayerNorm over the first `true_dim` lanes of a zero-padded [rows, Ep] block."""
    inv_n = 1.0 / true_dim
    mean = jnp.sum(x, axis=-1, keepdims=True) * inv_n       # pad lanes are zero -> exact
    xc = (x - mean) * lane_mask                              # re-zero the pad lanes
    var = jnp.sum(xc * xc, axis=-1, keepdims=True) * inv_n
    return xc * jax.lax.rsqrt(var + eps) * w + b             # w/b pads are zero -> pads stay 0


def decoder_block_kernel(
    x_ref,                    # [S, Ep]       f32   one sequence (zero-padded lanes)
    wqkv_ref,                 # [Ep, 3*H*Ap]  bf16  (1/sqrt(A) folded into Wq)
    bqkv_ref,                 # [1, 3*H*Ap]   f32
    wp_ref,                   # [H*Ap, Ep]    bf16
    w1_ref,                   # [Ep, Ep]      bf16
    w2_ref,                   # [Ep, Ep]      bf16
    vecs_ref,                 # [8, Ep]       f32   rows: bp, ln1w, ln1b, b1, b2, ln2w, ln2b, 0
    o_ref,                    # [S, Ep]       f32
    *, num_heads, pad_atten, embed_dim,
):
    H, Ap, E = num_heads, pad_atten, embed_dim
    bf16 = jnp.bfloat16
    S, Ep = x_ref.shape

    x = x_ref[...]                                            # [S, Ep] f32, pad lanes = 0
    lane_mask = (jax.lax.broadcasted_iota(jnp.int32, (S, Ep), 1) < E).astype(jnp.float32)

    # ---- fused Q/K/V projection for all heads: one MXU pass, one bf16 cast ----
    qkv = jnp.dot(x.astype(bf16), wqkv_ref[...], preferred_element_type=jnp.float32)
    qkv = (qkv + bqkv_ref[...]).astype(bf16)                  # [S, 3*H*Ap]

    # causal mask built in-kernel (no [S, S] HBM input / DMA)
    rows = jax.lax.broadcasted_iota(jnp.int32, (S, S), 0)
    cols = jax.lax.broadcasted_iota(jnp.int32, (S, S), 1)
    causal = jnp.where(cols > rows, jnp.float32(-1e30), jnp.float32(0.0))

    # ---- attention: per-head scores/PV on 128-lane-aligned slices, ONE fused projection ----
    # TODO(synk): switch this static python loop to lax.fori_loop(unroll=True) if H grows.
    heads = []
    for h in range(H):
        q = qkv[:, h * Ap:(h + 1) * Ap]                       # bf16, 128-aligned slice
        k = qkv[:, (H + h) * Ap:(H + h + 1) * Ap]
        v = qkv[:, (2 * H + h) * Ap:(2 * H + h + 1) * Ap]
        score = jax.lax.dot_general(                          # q @ k^T without a transpose op
            q, k, dimension_numbers=(((1,), (1,)), ((), ())),
            preferred_element_type=jnp.float32)
        score = score + causal
        score = score - jnp.max(score, axis=-1, keepdims=True)
        p = jnp.exp(score)
        p = p * pl.reciprocal(jnp.sum(p, axis=-1, keepdims=True), approx=True)  # EUP
        heads.append(jnp.dot(p.astype(bf16), v, preferred_element_type=jnp.float32))
    head_cat = jnp.concatenate(heads, axis=-1).astype(bf16)   # [S, H*Ap], 128-aligned concat
    attn = jnp.dot(head_cat, wp_ref[...], preferred_element_type=jnp.float32)

    vecs = vecs_ref[...]
    bp, ln1w, ln1b = vecs[0:1, :], vecs[1:2, :], vecs[2:3, :]
    b1, b2, ln2w, ln2b = vecs[3:4, :], vecs[4:5, :], vecs[5:6, :], vecs[6:7, :]

    atten = jnp.maximum(attn + bp, 0.0)                       # ReLU after attention projection
    resid = atten + x
    normed = _masked_layernorm(resid, ln1w, ln1b, lane_mask, E)

    h1 = jnp.maximum(
        jnp.dot(normed.astype(bf16), w1_ref[...], preferred_element_type=jnp.float32) + b1,
        0.0)
    ffn = jnp.dot(h1.astype(bf16), w2_ref[...], preferred_element_type=jnp.float32) + b2
    # TODO(synk): nn.Dropout(p=0.2) treated as identity (eval-mode semantics).

    final = ffn + normed
    o_ref[...] = _masked_layernorm(final, ln2w, ln2b, lane_mask, E)   # full 128-lane store


def fuse_params(pd, *, num_heads, atten_dim, embed_dim):
    """Fold scale into Wq/bq, fuse Q/K/V across heads, zero-pad to 128-lane layout,
    cast matmul weights to bf16, and pack the small bias/LN vectors into one array."""
    H, A, E = num_heads, atten_dim, embed_dim
    Ap = _pad_to(A, LANE)
    Ep = _pad_to(E, LANE)
    scale = math.sqrt(A)
    f32 = jnp.float32

    wqkv = jnp.zeros((Ep, 3 * H * Ap), f32)
    bqkv = jnp.zeros((1, 3 * H * Ap), f32)
    for h in range(H):
        wqkv = wqkv.at[:E, h * Ap:h * Ap + A].set(pd["wq"][h] / scale)
        wqkv = wqkv.at[:E, (H + h) * Ap:(H + h) * Ap + A].set(pd["wk"][h])
        wqkv = wqkv.at[:E, (2 * H + h) * Ap:(2 * H + h) * Ap + A].set(pd["wv"][h])
        bqkv = bqkv.at[:, h * Ap:h * Ap + A].set((pd["bq"][h] / scale).reshape(1, A))
        bqkv = bqkv.at[:, (H + h) * Ap:(H + h) * Ap + A].set(pd["bk"][h].reshape(1, A))
        bqkv = bqkv.at[:, (2 * H + h) * Ap:(2 * H + h) * Ap + A].set(pd["bv"][h].reshape(1, A))

    wp = jnp.zeros((H * Ap, Ep), f32)
    for h in range(H):
        wp = wp.at[h * Ap:h * Ap + A, :E].set(pd["wp"][h * A:(h + 1) * A, :])

    w1 = jnp.zeros((Ep, Ep), f32).at[:E, :E].set(pd["w1"])
    w2 = jnp.zeros((Ep, Ep), f32).at[:E, :E].set(pd["w2"])

    def vec(v):
        return jnp.zeros((1, Ep), f32).at[:, :E].set(v.reshape(1, E))

    vecs = jnp.concatenate([
        vec(pd["bp"]), vec(pd["ln1w"]), vec(pd["ln1b"]),
        vec(pd["b1"]), vec(pd["b2"]), vec(pd["ln2w"]), vec(pd["ln2b"]),
        jnp.zeros((1, Ep), f32),
    ], axis=0)                                                # [8, Ep]

    return dict(
        wqkv=wqkv.astype(jnp.bfloat16), bqkv=bqkv,
        wp=wp.astype(jnp.bfloat16),
        w1=w1.astype(jnp.bfloat16), w2=w2.astype(jnp.bfloat16),
        vecs=vecs, Ap=Ap, Ep=Ep)


def decoder_block(x, pd, *, num_heads, atten_dim):
    """x: [B, S, E] float32.  pd: dict of raw (per-head) parameters."""
    B, S, E = x.shape
    assert S % 8 == 0, "seq_len must be a multiple of 8 for the (8,128) block layout"

    fp = fuse_params(pd, num_heads=num_heads, atten_dim=atten_dim, embed_dim=E)
    Ap, Ep = fp["Ap"], fp["Ep"]

    x2 = x.reshape(B * S, E)
    x_pad = jnp.pad(x2, ((0, 0), (0, Ep - E))) if Ep != E else x2

    params = [fp["wqkv"], fp["bqkv"], fp["wp"], fp["w1"], fp["w2"], fp["vecs"]]

    kernel = functools.partial(
        decoder_block_kernel,
        num_heads=num_heads, pad_atten=Ap, embed_dim=E)

    def const_spec(arr):
        nd = arr.ndim
        return pl.BlockSpec(arr.shape, lambda b, _nd=nd: (0,) * _nd)

    out = pl.pallas_call(
        kernel,
        out_shape=jax.ShapeDtypeStruct((B * S, Ep), jnp.float32),
        grid_spec=pltpu.PrefetchScalarGridSpec(
            num_scalar_prefetch=0,
            grid=(B,),                                         # one sequence per grid step
            in_specs=[pl.BlockSpec((S, Ep), lambda b: (b, 0))]
                     + [const_spec(p) for p in params],
            out_specs=pl.BlockSpec((S, Ep), lambda b: (b, 0)),
        ),
        compiler_params=pltpu.CompilerParams(dimension_semantics=("parallel",)),
    )(x_pad, *params)

    return out[:, :E].reshape(B, S, E)


# ----------------------------- pure-JAX f32 reference -----------------------------
def _layernorm(x, w, b, eps=1e-5):
    mean = jnp.mean(x, axis=-1, keepdims=True)
    var = jnp.mean((x - mean) ** 2, axis=-1, keepdims=True)
    return (x - mean) * jax.lax.rsqrt(var + eps) * w + b


def reference_decoder_block(x, pd, *, num_heads, atten_dim):
    scale = math.sqrt(atten_dim)
    S = x.shape[1]
    mask = jnp.where(jnp.arange(S)[None, :] > jnp.arange(S)[:, None],
                     -jnp.inf, 0.0).astype(jnp.float32)
    outs = []
    for h in range(num_heads):
        q = x @ pd["wq"][h] + pd["bq"][h]
        k = x @ pd["wk"][h] + pd["bk"][h]
        v = x @ pd["wv"][h] + pd["bv"][h]
        score = (q @ jnp.swapaxes(k, -1, -2)) / scale + mask
        p = jax.nn.softmax(score, axis=-1)
        outs.append(p @ v)
    cat = jnp.concatenate(outs, axis=-1)
    atten = jax.nn.relu(cat @ pd["wp"] + pd["bp"])
    residual = atten + x
    normed = _layernorm(residual, pd["ln1w"], pd["ln1b"])
    h1 = jax.nn.relu(normed @ pd["w1"] + pd["b1"])
    ffn = h1 @ pd["w2"] + pd["b2"]
    final = ffn + normed
    return _layernorm(final, pd["ln2w"], pd["ln2b"])


if __name__ == "__main__":
    # module hyper-params (small, consistent with DecoderBlock.__init__)
    max_seq_len = 8
    atten_head_num = 2
    atten_dim = 16
    embed_dim = 32
    batch = 2

    key = jax.random.PRNGKey(0)
    ks = jax.random.split(key, 16)

    def uinit(k, shape, fan_in):
        bound = 1.0 / math.sqrt(fan_in)
        return jax.random.uniform(k, shape, jnp.float32, -bound, bound)

    H, A, E, S = atten_head_num, atten_dim, embed_dim, max_seq_len

    # stacked per-head projections (already transposed: [H, E, A])
    pd = dict(
        wq=uinit(ks[0], (H, E, A), E), bq=uinit(ks[1], (H, A), E),
        wk=uinit(ks[2], (H, E, A), E), bk=uinit(ks[3], (H, A), E),
        wv=uinit(ks[4], (H, E, A), E), bv=uinit(ks[5], (H, A), E),
        wp=uinit(ks[6], (H * A, E), H * A), bp=uinit(ks[7], (1, E), H * A),
        ln1w=jnp.ones((1, E), jnp.float32), ln1b=jnp.zeros((1, E), jnp.float32),
        w1=uinit(ks[8], (E, E), E), b1=uinit(ks[9], (1, E), E),
        w2=uinit(ks[10], (E, E), E), b2=uinit(ks[11], (1, E), E),
        ln2w=jnp.ones((1, E), jnp.float32), ln2b=jnp.zeros((1, E), jnp.float32),
    )

    x = jax.random.normal(ks[12], (batch, S, E), jnp.float32)

    out = decoder_block(x, pd, num_heads=H, atten_dim=A)
    out = jax.block_until_ready(out)

    ref = reference_decoder_block(x, pd, num_heads=H, atten_dim=A)
    assert out.shape == (batch, S, E)
    # bf16 matmul operands + approx reciprocal inside the kernel vs f32 reference.
    assert jnp.allclose(out, ref, atol=5e-2, rtol=5e-2), "mismatch vs. reference"
    print("KERNEL_OK")
</pallas_src>

<mosaic_0001>
module attributes {stable_mosaic.version = 11 : i64} {
  func.func @decoder_block_kernel(%arg0: i32, %arg1: memref<8x128xf32, #tpu.memory_space<vmem>>, %arg2: memref<128x768xbf16, #tpu.memory_space<vmem>>, %arg3: memref<1x768xf32, #tpu.memory_space<vmem>>, %arg4: memref<256x128xbf16, #tpu.memory_space<vmem>>, %arg5: memref<128x128xbf16, #tpu.memory_space<vmem>>, %arg6: memref<128x128xbf16, #tpu.memory_space<vmem>>, %arg7: memref<8x128xf32, #tpu.memory_space<vmem>>, %arg8: memref<8x128xf32, #tpu.memory_space<vmem>>) attributes {dimension_semantics = [#tpu.dimension_semantics<parallel>], iteration_bounds = array<i64: 2>, scalar_prefetch = 0 : i64, scratch_operands = 0 : i64, tpu.core_type = #tpu.core_type<tc>, window_params = [{transform_indices = @transform_0, window_bounds = array<i64: 8, 128>}, {pipeline_mode = #tpu.pipeline_mode<synchronous>, transform_indices = @transform_1, window_bounds = array<i64: 128, 768>}, {pipeline_mode = #tpu.pipeline_mode<synchronous>, transform_indices = @transform_2, window_bounds = array<i64: 1, 768>}, {pipeline_mode = #tpu.pipeline_mode<synchronous>, transform_indices = @transform_3, window_bounds = array<i64: 256, 128>}, {pipeline_mode = #tpu.pipeline_mode<synchronous>, transform_indices = @transform_4, window_bounds = array<i64: 128, 128>}, {pipeline_mode = #tpu.pipeline_mode<synchronous>, transform_indices = @transform_5, window_bounds = array<i64: 128, 128>}, {pipeline_mode = #tpu.pipeline_mode<synchronous>, transform_indices = @transform_6, window_bounds = array<i64: 8, 128>}, {transform_indices = @transform_7, window_bounds = array<i64: 8, 128>}]} {
    %c0 = arith.constant 0 : index
    %c0_0 = arith.constant 0 : index
    %0 = vector.load %arg1[%c0, %c0_0] : memref<8x128xf32, #tpu.memory_space<vmem>>, vector<8x128xf32>
    %1 = tpu.iota {dimensions = array<i32: 1>} : vector<8x128xi32>
    %c32_i32 = arith.constant 32 : i32
    %2 = vector.broadcast %c32_i32 : i32 to vector<8x128xi32>
    %3 = arith.cmpi slt, %1, %2 : vector<8x128xi32>
    %4 = arith.extui %3 : vector<8x128xi1> to vector<8x128xi32>
    %5 = arith.sitofp %4 : vector<8x128xi32> to vector<8x128xf32>
    %6 = arith.truncf %0 : vector<8x128xf32> to vector<8x128xbf16>
    %c0_1 = arith.constant 0 : index
    %c0_2 = arith.constant 0 : index
    %7 = vector.load %arg2[%c0_1, %c0_2] : memref<128x768xbf16, #tpu.memory_space<vmem>>, vector<128x768xbf16>
    %cst = arith.constant dense<0.000000e+00> : vector<8x768xf32>
    %8 = tpu.matmul %6, %7, %cst {dimension_numbers = #tpu.dot_dimension_numbers<[1], [0], [0], [1], [0, 0, 1, 1], [], []>} : vector<8x128xbf16>, vector<128x768xbf16>, vector<8x768xf32> -> vector<8x768xf32>
    %c0_3 = arith.constant 0 : index
    %c0_4 = arith.constant 0 : index
    %9 = vector.load %arg3[%c0_3, %c0_4] : memref<1x768xf32, #tpu.memory_space<vmem>>, vector<1x768xf32>
    %10 = vector.broadcast %9 : vector<1x768xf32> to vector<8x768xf32>
    %11 = arith.addf %8, %10 : vector<8x768xf32>
    %12 = arith.truncf %11 : vector<8x768xf32> to vector<8x768xbf16>
    %13 = tpu.iota {dimensions = array<i32: 0>} : vector<8x8xi32>
    %14 = tpu.iota {dimensions = array<i32: 1>} : vector<8x8xi32>
    %15 = arith.cmpi sgt, %14, %13 : vector<8x8xi32>
    %cst_5 = arith.constant -1.000000e+30 : f32
    %cst_6 = arith.constant 0.000000e+00 : f32
    %16 = vector.broadcast %cst_5 : f32 to vector<8x8xf32>
    %17 = vector.broadcast %cst_6 : f32 to vector<8x8xf32>
    %18 = arith.select %15, %16, %17 : vector<8x8xi1>, vector<8x8xf32>
    %19 = vector.extract_strided_slice %12 {offsets = [0, 0], sizes = [8, 128], strides = [1, 1]} : vector<8x768xbf16> to vector<8x128xbf16>
    %20 = vector.extract_strided_slice %12 {offsets = [0, 256], sizes = [8, 128], strides = [1, 1]} : vector<8x768xbf16> to vector<8x128xbf16>
    %21 = vector.extract_strided_slice %12 {offsets = [0, 512], sizes = [8, 128], strides = [1, 1]} : vector<8x768xbf16> to vector<8x128xbf16>
    %cst_7 = arith.constant dense<0.000000e+00> : vector<8x8xf32>
    %22 = tpu.matmul %19, %20, %cst_7 {dimension_numbers = #tpu.dot_dimension_numbers<[1], [1], [0], [0], [0, 0, 1, 0], [], []>} : vector<8x128xbf16>, vector<8x128xbf16>, vector<8x8xf32> -> vector<8x8xf32>
    %23 = arith.addf %22, %18 : vector<8x8xf32>
    %cst_8 = arith.constant dense<0xFF800000> : vector<8xf32>
    %24 = vector.multi_reduction <maximumf>, %23, %cst_8 [1] : vector<8x8xf32> to vector<8xf32>
    %25 = vector.shape_cast %24 : vector<8xf32> to vector<8x1xf32>
    %26 = vector.broadcast %25 : vector<8x1xf32> to vector<8x8xf32>
    %27 = arith.subf %23, %26 : vector<8x8xf32>
    %28 = math.exp %27 : vector<8x8xf32>
    %cst_9 = arith.constant dense<0.000000e+00> : vector<8xf32>
    %29 = vector.multi_reduction <add>, %28, %cst_9 [1] : vector<8x8xf32> to vector<8xf32>
    %30 = vector.shape_cast %29 : vector<8xf32> to vector<8x1xf32>
    %31 = tpu.reciprocal %30 {approx = true} : vector<8x1xf32> -> vector<8x1xf32>
    %32 = vector.broadcast %31 : vector<8x1xf32> to vector<8x8xf32>
    %33 = arith.mulf %28, %32 : vector<8x8xf32>
    %34 = arith.truncf %33 : vector<8x8xf32> to vector<8x8xbf16>
    %cst_10 = arith.constant dense<0.000000e+00> : vector<8x128xf32>
    %35 = tpu.matmul %34, %21, %cst_10 {dimension_numbers = #tpu.dot_dimension_numbers<[1], [0], [0], [1], [0, 0, 1, 1], [], []>} : vector<8x8xbf16>, vector<8x128xbf16>, vector<8x128xf32> -> vector<8x128xf32>
    %36 = vector.extract_strided_slice %12 {offsets = [0, 128], sizes = [8, 128], strides = [1, 1]} : vector<8x768xbf16> to vector<8x128xbf16>
    %37 = vector.extract_strided_slice %12 {offsets = [0, 384], sizes = [8, 128], strides = [1, 1]} : vector<8x768xbf16> to vector<8x128xbf16>
    %38 = vector.extract_strided_slice %12 {offsets = [0, 640], sizes = [8, 128], strides = [1, 1]} : vector<8x768xbf16> to vector<8x128xbf16>
    %cst_11 = arith.constant dense<0.000000e+00> : vector<8x8xf32>
    %39 = tpu.matmul %36, %37, %cst_11 {dimension_numbers = #tpu.dot_dimension_numbers<[1], [1], [0], [0], [0, 0, 1, 0], [], []>} : vector<8x128xbf16>, vector<8x128xbf16>, vector<8x8xf32> -> vector<8x8xf32>
    %40 = arith.addf %39, %18 : vector<8x8xf32>
    %cst_12 = arith.constant dense<0xFF800000> : vector<8xf32>
    %41 = vector.multi_reduction <maximumf>, %40, %cst_12 [1] : vector<8x8xf32> to vector<8xf32>
    %42 = vector.shape_cast %41 : vector<8xf32> to vector<8x1xf32>
    %43 = vector.broadcast %42 : vector<8x1xf32> to vector<8x8xf32>
    %44 = arith.subf %40, %43 : vector<8x8xf32>
    %45 = math.exp %44 : vector<8x8xf32>
    %cst_13 = arith.constant dense<0.000000e+00> : vector<8xf32>
    %46 = vector.multi_reduction <add>, %45, %cst_13 [1] : vector<8x8xf32> to vector<8xf32>
    %47 = vector.shape_cast %46 : vector<8xf32> to vector<8x1xf32>
    %48 = tpu.reciprocal %47 {approx = true} : vector<8x1xf32> -> vector<8x1xf32>
    %49 = vector.broadcast %48 : vector<8x1xf32> to vector<8x8xf32>
    %50 = arith.mulf %45, %49 : vector<8x8xf32>
    %51 = arith.truncf %50 : vector<8x8xf32> to vector<8x8xbf16>
    %cst_14 = arith.constant dense<0.000000e+00> : vector<8x128xf32>
    %52 = tpu.matmul %51, %38, %cst_14 {dimension_numbers = #tpu.dot_dimension_numbers<[1], [0], [0], [1], [0, 0, 1, 1], [], []>} : vector<8x8xbf16>, vector<8x128xbf16>, vector<8x128xf32> -> vector<8x128xf32>
    %53 = tpu.concatenate %35, %52 in 1 : vector<8x128xf32>, vector<8x128xf32> -> vector<8x256xf32>
    %54 = arith.truncf %53 : vector<8x256xf32> to vector<8x256xbf16>
    %c0_15 = arith.constant 0 : index
    %c0_16 = arith.constant 0 : index
    %55 = vector.load %arg4[%c0_15, %c0_16] : memref<256x128xbf16, #tpu.memory_space<vmem>>, vector<256x128xbf16>
    %cst_17 = arith.constant dense<0.000000e+00> : vector<8x128xf32>
    %56 = tpu.matmul %54, %55, %cst_17 {dimension_numbers = #tpu.dot_dimension_numbers<[1], [0], [0], [1], [0, 0, 1, 1], [], []>} : vector<8x256xbf16>, vector<256x128xbf16>, vector<8x128xf32> -> vector<8x128xf32>
    %c0_18 = arith.constant 0 : index
    %c0_19 = arith.constant 0 : index
    %57 = vector.load %arg7[%c0_18, %c0_19] : memref<8x128xf32, #tpu.memory_space<vmem>>, vector<8x128xf32>
    %58 = vector.extract_strided_slice %57 {offsets = [0, 0], sizes = [1, 128], strides = [1, 1]} : vector<8x128xf32> to vector<1x128xf32>
    %59 = vector.extract_strided_slice %57 {offsets = [1, 0], sizes = [1, 128], strides = [1, 1]} : vector<8x128xf32> to vector<1x128xf32>
    %60 = vector.extract_strided_slice %57 {offsets = [2, 0], sizes = [1, 128], strides = [1, 1]} : vector<8x128xf32> to vector<1x128xf32>
    %61 = vector.extract_strided_slice %57 {offsets = [3, 0], sizes = [1, 128], strides = [1, 1]} : vector<8x128xf32> to vector<1x128xf32>
    %62 = vector.extract_strided_slice %57 {offsets = [4, 0], sizes = [1, 128], strides = [1, 1]} : vector<8x128xf32> to vector<1x128xf32>
    %63 = vector.extract_strided_slice %57 {offsets = [5, 0], sizes = [1, 128], strides = [1, 1]} : vector<8x128xf32> to vector<1x128xf32>
    %64 = vector.extract_strided_slice %57 {offsets = [6, 0], sizes = [1, 128], strides = [1, 1]} : vector<8x128xf32> to vector<1x128xf32>
    %65 = vector.broadcast %58 : vector<1x128xf32> to vector<8x128xf32>
    %66 = arith.addf %56, %65 : vector<8x128xf32>
    %cst_20 = arith.constant 0.000000e+00 : f32
    %67 = vector.broadcast %cst_20 : f32 to vector<8x128xf32>
    %68 = arith.maximumf %66, %67 : vector<8x128xf32>
    %69 = arith.addf %68, %0 : vector<8x128xf32>
    %cst_21 = arith.constant dense<0.000000e+00> : vector<8xf32>
    %70 = vector.multi_reduction <add>, %69, %cst_21 [1] : vector<8x128xf32> to vector<8xf32>
    %71 = vector.shape_cast %70 : vector<8xf32> to vector<8x1xf32>
    %cst_22 = arith.constant 3.125000e-02 : f32
    %72 = vector.broadcast %cst_22 : f32 to vector<8x1xf32>
    %73 = arith.mulf %71, %72 : vector<8x1xf32>
    %74 = vector.broadcast %73 : vector<8x1xf32> to vector<8x128xf32>
    %75 = arith.subf %69, %74 : vector<8x128xf32>
    %76 = arith.mulf %75, %5 : vector<8x128xf32>
    %77 = arith.mulf %76, %76 : vector<8x128xf32>
    %cst_23 = arith.constant dense<0.000000e+00> : vector<8xf32>
    %78 = vector.multi_reduction <add>, %77, %cst_23 [1] : vector<8x128xf32> to vector<8xf32>
    %79 = vector.shape_cast %78 : vector<8xf32> to vector<8x1xf32>
    %cst_24 = arith.constant 3.125000e-02 : f32
    %80 = vector.broadcast %cst_24 : f32 to vector<8x1xf32>
    %81 = arith.mulf %79, %80 : vector<8x1xf32>
    %cst_25 = arith.constant 9.99999974E-6 : f32
    %82 = vector.broadcast %cst_25 : f32 to vector<8x1xf32>
    %83 = arith.addf %81, %82 : vector<8x1xf32>
    %84 = math.rsqrt %83 : vector<8x1xf32>
    %85 = vector.broadcast %84 : vector<8x1xf32> to vector<8x128xf32>
    %86 = arith.mulf %76, %85 : vector<8x128xf32>
    %87 = vector.broadcast %59 : vector<1x128xf32> to vector<8x128xf32>
    %88 = arith.mulf %86, %87 : vector<8x128xf32>
    %89 = vector.broadcast %60 : vector<1x128xf32> to vector<8x128xf32>
    %90 = arith.addf %88, %89 : vector<8x128xf32>
    %91 = arith.truncf %90 : vector<8x128xf32> to vector<8x128xbf16>
    %c0_26 = arith.constant 0 : index
    %c0_27 = arith.constant 0 : index
    %92 = vector.load %arg5[%c0_26, %c0_27] : memref<128x128xbf16, #tpu.memory_space<vmem>>, vector<128x128xbf16>
    %cst_28 = arith.constant dense<0.000000e+00> : vector<8x128xf32>
    %93 = tpu.matmul %91, %92, %cst_28 {dimension_numbers = #tpu.dot_dimension_numbers<[1], [0], [0], [1], [0, 0, 1, 1], [], []>} : vector<8x128xbf16>, vector<128x128xbf16>, vector<8x128xf32> -> vector<8x128xf32>
    %94 = vector.broadcast %61 : vector<1x128xf32> to vector<8x128xf32>
    %95 = arith.addf %93, %94 : vector<8x128xf32>
    %cst_29 = arith.constant 0.000000e+00 : f32
    %96 = vector.broadcast %cst_29 : f32 to vector<8x128xf32>
    %97 = arith.maximumf %95, %96 : vector<8x128xf32>
    %98 = arith.truncf %97 : vector<8x128xf32> to vector<8x128xbf16>
    %c0_30 = arith.constant 0 : index
    %c0_31 = arith.constant 0 : index
    %99 = vector.load %arg6[%c0_30, %c0_31] : memref<128x128xbf16, #tpu.memory_space<vmem>>, vector<128x128xbf16>
    %cst_32 = arith.constant dense<0.000000e+00> : vector<8x128xf32>
    %100 = tpu.matmul %98, %99, %cst_32 {dimension_numbers = #tpu.dot_dimension_numbers<[1], [0], [0], [1], [0, 0, 1, 1], [], []>} : vector<8x128xbf16>, vector<128x128xbf16>, vector<8x128xf32> -> vector<8x128xf32>
    %101 = vector.broadcast %62 : vector<1x128xf32> to vector<8x128xf32>
    %102 = arith.addf %100, %101 : vector<8x128xf32>
    %103 = arith.addf %102, %90 : vector<8x128xf32>
    %cst_33 = arith.constant dense<0.000000e+00> : vector<8xf32>
    %104 = vector.multi_reduction <add>, %103, %cst_33 [1] : vector<8x128xf32> to vector<8xf32>
    %105 = vector.shape_cast %104 : vector<8xf32> to vector<8x1xf32>
    %cst_34 = arith.constant 3.125000e-02 : f32
    %106 = vector.broadcast %cst_34 : f32 to vector<8x1xf32>
    %107 = arith.mulf %105, %106 : vector<8x1xf32>
    %108 = vector.broadcast %107 : vector<8x1xf32> to vector<8x128xf32>
    %109 = arith.subf %103, %108 : vector<8x128xf32>
    %110 = arith.mulf %109, %5 : vector<8x128xf32>
    %111 = arith.mulf %110, %110 : vector<8x128xf32>
    %cst_35 = arith.constant dense<0.000000e+00> : vector<8xf32>
    %112 = vector.multi_reduction <add>, %111, %cst_35 [1] : vector<8x128xf32> to vector<8xf32>
    %113 = vector.shape_cast %112 : vector<8xf32> to vector<8x1xf32>
    %cst_36 = arith.constant 3.125000e-02 : f32
    %114 = vector.broadcast %cst_36 : f32 to vector<8x1xf32>
    %115 = arith.mulf %113, %114 : vector<8x1xf32>
    %cst_37 = arith.constant 9.99999974E-6 : f32
    %116 = vector.broadcast %cst_37 : f32 to vector<8x1xf32>
    %117 = arith.addf %115, %116 : vector<8x1xf32>
    %118 = math.rsqrt %117 : vector<8x1xf32>
    %119 = vector.broadcast %118 : vector<8x1xf32> to vector<8x128xf32>
    %120 = arith.mulf %110, %119 : vector<8x128xf32>
    %121 = vector.broadcast %63 : vector<1x128xf32> to vector<8x128xf32>
    %122 = arith.mulf %120, %121 : vector<8x128xf32>
    %123 = vector.broadcast %64 : vector<1x128xf32> to vector<8x128xf32>
    %124 = arith.addf %122, %123 : vector<8x128xf32>
    %c0_38 = arith.constant 0 : index
    %c0_39 = arith.constant 0 : index
    %125 = vector.load %arg8[%c0_38, %c0_39] : memref<8x128xf32, #tpu.memory_space<vmem>>, vector<8x128xf32>
    tpu.vector_store %arg8[%c0_38, %c0_39], %124 {strides = array<i32>} : memref<8x128xf32, #tpu.memory_space<vmem>>, vector<8x128xf32>,
    return
  }
  func.func @transform_0(%arg0: i32) -> (i32, i32) {
    %c0_i32 = arith.constant 0 : i32
    %c0_i32_0 = arith.constant 0 : i32
    return %arg0, %c0_i32 : i32, i32
  }
  func.func @transform_1(%arg0: i32) -> (i32, i32) {
    %c0_i32 = arith.constant 0 : i32
    %c0_i32_0 = arith.constant 0 : i32
    %c0_i32_1 = arith.constant 0 : i32
    return %c0_i32, %c0_i32_0 : i32, i32
  }
  func.func @transform_2(%arg0: i32) -> (i32, i32) {
    %c0_i32 = arith.constant 0 : i32
    %c0_i32_0 = arith.constant 0 : i32
    %c0_i32_1 = arith.constant 0 : i32
    return %c0_i32, %c0_i32_0 : i32, i32
  }
  func.func @transform_3(%arg0: i32) -> (i32, i32) {
    %c0_i32 = arith.constant 0 : i32
    %c0_i32_0 = arith.constant 0 : i32
    %c0_i32_1 = arith.constant 0 : i32
    return %c0_i32, %c0_i32_0 : i32, i32
  }
  func.func @transform_4(%arg0: i32) -> (i32, i32) {
    %c0_i32 = arith.constant 0 : i32
    %c0_i32_0 = arith.constant 0 : i32
    %c0_i32_1 = arith.constant 0 : i32
    return %c0_i32, %c0_i32_0 : i32, i32
  }
  func.func @transform_5(%arg0: i32) -> (i32, i32) {
    %c0_i32 = arith.constant 0 : i32
    %c0_i32_0 = arith.constant 0 : i32
    %c0_i32_1 = arith.constant 0 : i32
    return %c0_i32, %c0_i32_0 : i32, i32
  }
  func.func @transform_6(%arg0: i32) -> (i32, i32) {
    %c0_i32 = arith.constant 0 : i32
    %c0_i32_0 = arith.constant 0 : i32
    %c0_i32_1 = arith.constant 0 : i32
    return %c0_i32, %c0_i32_0 : i32, i32
  }
  func.func @transform_7(%arg0: i32) -> (i32, i32) {
    %c0_i32 = arith.constant 0 : i32
    %c0_i32_0 = arith.constant 0 : i32
    return %arg0, %c0_i32 : i32, i32
  }
}

</mosaic_0001>

<bundles_post_ra>
// kernel: tpu_custom_call.1
= control target key start
LH: loop header
LB: loop body
LE: loop exit
PB: predicated region body
PF: predicated region fallthrough
CT: control target
= control target key end

     0   :  { %12 = vsyncpa [#allocation3], 0  ;;  %s2691_s0 = inlined_call_operand.hbm [shape: f32[16,128], index: 0, kind: input, shape index: {}]   ;;  %s2692_s1 = inlined_call_operand.hbm [shape: bf16[128,768], index: 1, kind: input, shape index: {}]   ;;  %s2693_s2 = inlined_call_operand.vmem [shape: f32[1,768], index: 2, kind: input, shape index: {}]   ;;  %s2694_s3 = inlined_call_operand.hbm [shape: bf16[256,128], index: 3, kind: input, shape index: {}]   ;;  %s2695_s4 = inlined_call_operand.hbm [shape: bf16[128,128], index: 4, kind: input, shape index: {}]   ;;  %s2696_s5 = inlined_call_operand.hbm [shape: bf16[128,128], index: 5, kind: input, shape index: {}]   ;;  %s2697_s6 = inlined_call_operand.vmem [shape: f32[8,128], index: 6, kind: input, shape index: {}]   ;;  %s2698_s7 = inlined_call_operand.hbm [shape: f32[16,128], index: 7, kind: output, shape index: {}]  }
   0x1   :  { %14 = vsyncpa [#allocation3 + $0x1], 0 }
   0x2   :  { %15 = vsyncpa [#allocation6], 0 }
   0x3   :  { %16 = vsyncpa [#allocation9], 0 }
   0x4   :  { %17 = vsyncpa [#allocation4], 0 }
   0x5   :  { %19 = vsyncpa [#allocation4 + $0x1], 0  ;;  %s2271_s24 = smov 0   ;;  %s2273_s25 = smov 0  }
   0x6   :  { %s2275_s26 = smov 0   ;;  %s2277_s27 = smov 0  }
   0x7 LB: > { %s2218_s28 = smov [#allocation5]   ;;  %s2292_s30 = sadd.s32 4294967295, %s2216_s27   ;;  %s2216_s27 = sphi %s2277_s27, %s2722_s27   ;;  %s2212_s26 = sphi %s2275_s26, %s2721_s26   ;;  %s2208_s25 = sphi %s2273_s25, %s2720_s25   ;;  %s2204_s24 = sphi %s2271_s24, %s2719_s24  }
   0x8   : > { %s220_s29 = sshll.u32 %s2218_s28, 4  ;;  %p1576_p0 = scmp.ge.s32.totalorder %s2216_s27, 1  ;;  %s2297_s29 = int_to_ptr.vmem [resolvable:$true] %s220_s29 }
   0x9   : > { %p2699_p1 = scmp.eq.s32.totalorder %s2292_s30, 0  ;;  %p208_p2 = scmp.lt.s32.totalorder %s2216_s27, 3 }
   0xa   : > { %s2219_s10 = smov [#allocation8]   ;;  %s2220_s12 = smov [#allocation7]  }
   0xb   : > { %p2299_p3 = pnand %p1576_p0, %p208_p2  ;;  %s249_s11 = sshll.u32 %s2219_s10, 4  ;;  %s2312_s11 = int_to_ptr.vmem [resolvable:$true] %s249_s11 }
   0xc   : > { %s2314_s13 = sshll.u32 %s2220_s12, 4  ;;  %s2000_s16 = scalar_lea.hbm %s2692_s1, 6144  ;;  %s237_s13 = int_to_ptr.vmem [resolvable:$true] %s2314_s13 }
   0xd   : > { %s2702_s8 = scalar_select %p2299_p3, 1, 0 }
   0xe   : > { %p1810_p5 = pneg %p2299_p3  ;;  %p2001_p7 = scmp.ne.s32.totalorder %s2692_s1, %s2000_s16 }
   0xf   : > { %p2007_p11 = scmp.lt.u32.totalorder %s2000_s16, %s2692_s1 }
  0x10   : > { %p2308_p6 = pnand %p1810_p5, %p2699_p1 }
  0x12   : > { %p2324_p8 = pneg %p2308_p6 }
  0x14   : > { %p2003_p9 = pnand %p2324_p8, %p2001_p7 }
  0x16   : > { %p2004_p10 = pneg %p2003_p9 }
  0x18   : > { %p2009_p12 = pnand %p2007_p11, %p2004_p10 }
  0x1a   : > { %2012 = shalt.err (!%p2009_p12)
}
  0x1b   : > { %s2013_s22 = scalar_lea.vmem %s2297_s29, 6144  ;;  %p2021_p5 = scmp.lt.s32.totalorder %s2297_s29, %s2297_s29 }
  0x1c   : > { %p2014_p13 = scmp.ne.s32.totalorder %s2297_s29, %s2013_s22  ;;  %p2022_p4 = scmp.lt.s32.totalorder %s2013_s22, %s2013_s22 }
  0x1e   : > { %p2016_p0 = pnand %p2014_p13, %p2324_p8  ;;  %p2023_p7 = por %p2022_p4, %p2021_p5 }
  0x20   : > { %p2017_p2 = pneg %p2016_p0 }
  0x22   : > { %p2024_p9 = pnand %p2023_p7, %p2017_p2 }
  0x24   : > { %2027 = shalt.err (!%p2024_p9)
}
  0x25   : > { %s2221_s23 = smov 384   ;;  %s2222_s28 = smov 24  }
  0x26   : > { %1813 = dma.hbm_to_vmem [thread:$0]  (!%p2308_p6), %s2692_s1, 6144, %s2297_s29, [#allocation6], %s2221_s23, %s2221_s23, %s2222_s28  }
  0x27   : > { %s2028_s16 = scalar_lea.hbm %s2695_s4, 1024 }
  0x28   : > { %p2029_p4 = scmp.ne.s32.totalorder %s2695_s4, %s2028_s16  ;;  %p2035_p12 = scmp.lt.u32.totalorder %s2028_s16, %s2695_s4 }
  0x2a   : > { %p2031_p10 = pnand %p2029_p4, %p2324_p8 }
  0x2c   : > { %p2032_p11 = pneg %p2031_p10 }
  0x2e   : > { %p2037_p13 = pnand %p2035_p12, %p2032_p11 }
  0x30   : > { %2040 = shalt.err (!%p2037_p13)
}
  0x31   : > { %s2041_s29 = scalar_lea.vmem %s2312_s11, 1024  ;;  %p2049_p7 = scmp.lt.s32.totalorder %s2312_s11, %s2312_s11 }
  0x32   : > { %p2042_p0 = scmp.ne.s32.totalorder %s2312_s11, %s2041_s29  ;;  %p2050_p9 = scmp.lt.s32.totalorder %s2041_s29, %s2041_s29 }
  0x34   : > { %p2044_p2 = pnand %p2042_p0, %p2324_p8  ;;  %p2051_p4 = por %p2050_p9, %p2049_p7 }
  0x36   : > { %p2045_p5 = pneg %p2044_p2 }
  0x38   : > { %p2052_p10 = pnand %p2051_p4, %p2045_p5 }
  0x3a   : > { %2055 = shalt.err (!%p2052_p10)
}
  0x3b   : > { %s2223_s22 = smov 64   ;;  %s2224_s23 = smov 4  }
  0x3c   : > { %1819 = dma.hbm_to_vmem [thread:$0]  (!%p2308_p6), %s2695_s4, 1024, %s2312_s11, [#allocation9], %s2223_s22, %s2223_s22, %s2224_s23  }
  0x3d   : > { %s2056_s15 = scalar_lea.hbm %s2694_s3, 2048 }
  0x3e   : > { %p2057_p11 = scmp.ne.s32.totalorder %s2694_s3, %s2056_s15  ;;  %p2063_p0 = scmp.lt.u32.totalorder %s2056_s15, %s2694_s3 }
  0x40   : > { %p2059_p12 = pnand %p2057_p11, %p2324_p8 }
  0x42   : > { %p2060_p13 = pneg %p2059_p12 }
  0x44   : > { %p2065_p2 = pnand %p2063_p0, %p2060_p13 }
  0x46   : > { %2068 = shalt.err (!%p2065_p2)
}
  0x47   : > { %s2069_s21 = scalar_lea.vmem %s237_s13, 2048  ;;  %p2077_p4 = scmp.lt.s32.totalorder %s237_s13, %s237_s13 }
  0x48   : > { %p2070_p5 = scmp.ne.s32.totalorder %s237_s13, %s2069_s21  ;;  %p2078_p10 = scmp.lt.s32.totalorder %s2069_s21, %s2069_s21 }
  0x4a   : > { %p2072_p7 = pnand %p2070_p5, %p2324_p8  ;;  %p2079_p1 = por %p2078_p10, %p2077_p4 }
  0x4c   : > { %p2073_p9 = pneg %p2072_p7 }
  0x4e   : > { %p2080_p3 = pnand %p2079_p1, %p2073_p9 }
  0x50   : > { %2083 = shalt.err (!%p2080_p3)
}
  0x51   : > { %1816 = dma.hbm_to_vmem [thread:$0]  (!%p2308_p6), %s2694_s3, 2048, %s237_s13, [#allocation6], %s2223_s22, %s2223_s22, %s2224_s23  }
  0x52   : > { %s2225_s28 = smov [#allocation10]   ;;  %s2084_s15 = scalar_lea.hbm %s2696_s5, 1024 }
  0x53   : > { %s262_s10 = sshll.u32 %s2225_s28, 4  ;;  %p2085_p1 = scmp.ne.s32.totalorder %s2696_s5, %s2084_s15  ;;  %s263_s10 = int_to_ptr.vmem [resolvable:$true] %s262_s10 }
  0x54   : > { %p2091_p12 = scmp.lt.u32.totalorder %s2084_s15, %s2696_s5 }
  0x55   : > { %p2087_p3 = pnand %p2085_p1, %p2324_p8 }
  0x57   : > { %p2088_p11 = pneg %p2087_p3 }
  0x59   : > { %p2093_p13 = pnand %p2091_p12, %p2088_p11 }
  0x5b   : > { %2096 = shalt.err (!%p2093_p13)
}
  0x5c   : > { %s2097_s13 = scalar_lea.vmem %s263_s10, 1024  ;;  %p2105_p7 = scmp.lt.s32.totalorder %s263_s10, %s263_s10 }
  0x5d   : > { %p2098_p0 = scmp.ne.s32.totalorder %s263_s10, %s2097_s13  ;;  %p2106_p9 = scmp.lt.s32.totalorder %s2097_s13, %s2097_s13 }
  0x5f   : > { %p2100_p2 = pnand %p2098_p0, %p2324_p8  ;;  %p2107_p4 = por %p2106_p9, %p2105_p7 }
  0x61   : > { %p2101_p5 = pneg %p2100_p2 }
  0x63   : > { %p2108_p10 = pnand %p2107_p4, %p2101_p5 }
  0x65   : > { %2111 = shalt.err (!%p2108_p10)
}
  0x66   : > { %1822 = dma.hbm_to_vmem [thread:$0]  (!%p2308_p6), %s2696_s5, 1024, %s263_s10, [#allocation9], %s2223_s22, %s2223_s22, %s2224_s23  }
  0x67   : > { %s1575_s9 = sadd.s32 4294967294, %s2216_s27   ;;  %s2416_s19 = sadd.s32 1, %s2216_s27  }
  0x68   : > { %s29_s29 = ssub.s32 %s2216_s27, %s2416_s19  ;;  %s32_s28 = sadd.s32 1, %s2212_s26 }
  0x69   : > { %p30_p8 = scmp.eq.s32.totalorder %s29_s29, 0  ;;  %p39_p1 = scmp.ne.s32.totalorder %s2212_s26, %s2208_s25 }
  0x6a   : > { %p40_p3 = scmp.eq.s32.totalorder %s2216_s27, 0  ;;  %p45_p11 = scmp.ne.s32.totalorder %s2208_s25, %s2204_s24 }
  0x6b   : > { %s2427_s12 = scalar_select %p30_p8, %s2212_s26, %s32_s28  }
  0x6c   : > { %p2429_p12 = por %p40_p3, %p39_p1  ;;  %p2706_p13 = scmp.eq.s32.totalorder %s2292_s30, 0 }
  0x6d   : > { %p195_p0 = scmp.eq.s32.totalorder %s2292_s30, 1  ;;  %p201_p2 = scmp.eq.s32.totalorder %s1575_s9, 1 }
  0x6e   : > { %p2435_p6 = por %p2706_p13, %p45_p11  ;;  %p1835_p5 = scmp.lt.s32.totalorder %s2216_s27, 2 }
  0x6f   : > { %s279_s23 = sand.u32 1, %s2212_s26   ;;  %p2442_p7 = por %p195_p0, %p39_p1 }
  0x70   : > { %p2446_p9 = por %p201_p2, %p45_p11  ;;  %s1582_s16 = sshll.u32 %s279_s23, 3 }
  0x71   : > { %s2708_s10 = scalar_select %p2442_p7, 1, 0 }
  0x72   : > { %s2709_s15 = scalar_select %p2446_p9, 1, 0 }
  0x73   : > { %s1583_s17 = sshll.u32 %s2216_s27, 7  ;;  %s283_s21 = scalar_lea.vmem [#allocation2], %s1582_s16 }
  0x74   : > { %s2454_s13 = scalar_lea.hbm %s2691_s0, %s1583_s17  ;;  %s290_s11 = sshll.u32 %s283_s21, 4  ;;  %s2456_s11 = int_to_ptr.vmem [resolvable:$true] %s290_s11 }
  0x75   : > { %p2460_p4 = pnand %p1835_p5, %p2429_p12  ;;  %s280_s29 = scalar_lea.sflag [#allocation3], %s279_s23 }
  0x76   : > { %s2112_s28 = scalar_lea.hbm %s2454_s13, 128  ;;  %s2117_s18 = scalar_lea.hbm %s2691_s0, 256 }
  0x77   : > { %p2113_p10 = scmp.ne.s32.totalorder %s2454_s13, %s2112_s28  ;;  %p2114_p8 = pneg %p2460_p4 }
  0x78   : > { %p2118_p11 = scmp.lt.u32.totalorder %s2454_s13, %s2691_s0  ;;  %p2119_p12 = scmp.lt.u32.totalorder %s2117_s18, %s2112_s28 }
  0x79   : > { %p2115_p1 = pnand %p2114_p8, %p2113_p10  ;;  %p2121_p0 = scmp.lt.u32.totalorder %s2112_s28, %s2454_s13 }
  0x7a   : > { %p2120_p13 = por %p2119_p12, %p2118_p11 }
  0x7b   : > { %p2116_p3 = pneg %p2115_p1 }
  0x7c   : > { %p2122_p2 = por %p2121_p0, %p2120_p13 }
  0x7e   : > { %p2123_p5 = pnand %p2122_p2, %p2116_p3 }
  0x80   : > { %2126 = shalt.err (!%p2123_p5)
}
  0x81   : > { %s2127_s23 = scalar_lea.vmem %s2456_s11, 128  ;;  %s2226_s21 = smov [#allocation2]  }
  0x82   : > { %p2128_p10 = scmp.ne.s32.totalorder %s2456_s11, %s2127_s23  ;;  %s2132_s16 = sshll.u32 %s2226_s21, 4  ;;  %s2133_s16 = int_to_ptr.vmem [resolvable:$false] %s2132_s16 }
  0x83   : > { %s2134_s17 = scalar_lea.vmem %s2133_s16, 256  ;;  %p2135_p7 = scmp.lt.s32.totalorder %s2456_s11, %s2133_s16 }
  0x84   : > { %p2130_p1 = pnand %p2128_p10, %p2114_p8  ;;  %p2136_p11 = scmp.lt.s32.totalorder %s2134_s17, %s2127_s23 }
  0x86   : > { %p2131_p9 = pneg %p2130_p1  ;;  %p2137_p12 = por %p2136_p11, %p2135_p7 }
  0x88   : > { %p2138_p13 = pnand %p2137_p12, %p2131_p9 }
  0x8a   : > { %2141 = shalt.err (!%p2138_p13)
}
  0x8b   : > { %1826 = dma.hbm_to_vmem [thread:$0]  (!%p2460_p4), %s2454_s13, 128, %s2456_s11, %s280_s29  }
  0x8c   : > { %p2711_p3 = scmp.ne.s32.totalorder %s2702_s8, 0 }
  0x8d   : > { %s2492_s28 = sand.u32 (!%p2711_p3), 1, %s2208_s25  }
  0x8e   : > { %299 = sbr.rel (%p2711_p3) target bundleno = 2993 (0xbb1), region = 48  ;;  %s1585_s18 = sshll.u32 (!%p2711_p3), %s2492_s28, 3 }
  0x8f   : > { %s302_s14 = scalar_lea.sflag (!%p2711_p3), [#allocation3], %s2492_s28  ;;  %s2498_s20 = scalar_lea.vmem (!%p2711_p3), [#allocation2], %s1585_s18 }
  0x95   : > { %2187 = dma.done.wait (%p2435_p6), %s302_s14, 128  }
  0x96   : > { %2189 = vsyncadd (%p2435_p6), %s302_s14, 4294967168  ;;  %p2712_p7 = scmp.eq.s32.totalorder %s2292_s30, 0 }
  0x98   : > { %2191 = dma.done.wait (%p2712_p7), [#allocation6], 8192   ;;  %p2713_p9 = pmov %p2712_p7 }
  0x99   : > { %p2714_p4 = pmov %p2712_p7 }
  0x9a   : > { %2193 = vsyncadd (%p2713_p9), [#allocation6], 4294959104 }
  0x9b   : > { %2195 = dma.done.wait (%p2714_p4), [#allocation9], 2048   ;;  %p2715_p8 = pmov %p2714_p4 }
  0x9c   : > { %v2227_v0 = vmov 0   ;;  %v1884_v1 = vld [vmem:[#allocation5 + $0xc] ss:$24 sps:$4 sm:$0xff]   ;;  %v1886_v2 = vld [vmem:[#allocation5 + $0x8] ss:$24 sps:$4 sm:$0xff]   ;;  %v2515_v31 = vld [vmem:[%s2498_s20] sm:$0xff]  ;;  %v354_v36 = vlaneseq }
  0x9d   : > { %2197 = vsyncadd (%p2715_p8), [#allocation9], 4294965248  ;;  %753 = vmatprep.mubr.bf16.mxu1 %v2227_v0  ;;  %712 = vmatprep.mubr.bf16.mxu0 %v2227_v0  ;;  %v1887_v3 = vld [vmem:[#allocation5 + $0x3c] ss:$24 sps:$4 sm:$0xff]   ;;  %v1891_v5 = vld [vmem:[#allocation5 + $0x38] ss:$24 sps:$4 sm:$0xff]   ;;  %v2519_v34 = vpack.c.bf16 %v2515_v31, %v2515_v31 }
  0x9e   : > { %721 = vmatprep.subr.bf16.mxu1 %v1884_v1  ;;  %v1889_v4 = vld [vmem:[#allocation5 + $0x4] ss:$24 sps:$4 sm:$0xff]   ;;  %v1892_v6 = vld [vmem:[#allocation5] ss:$24 sps:$4 sm:$0xff]   ;;  %v1895_v8 = vld [vmem:[#allocation5 + $0x34] ss:$24 sps:$4 sm:$0xff]  }
  0x9f   : > { %722 = vmatpush1.bf16.msra.mxu1 %v1886_v2  ;;  %v1893_v7 = vld [vmem:[#allocation5 + $0x6c] ss:$24 sps:$4 sm:$0xff]   ;;  %680 = vmatprep.subr.bf16.mxu0 %v1889_v4  ;;  %v1898_v9 = vld [vmem:[#allocation5 + $0x30] ss:$24 sps:$4 sm:$0xff]   ;;  %v1899_v11 = vld [vmem:[#allocation5 + $0x9c] ss:$24 sps:$4 sm:$0xff]  }
  0xa0   : > { %723 = vmatprep.subr.bf16.mxu1 %v1887_v3  ;;  %681 = vmatpush1.bf16.msra.mxu0 %v1892_v6  ;;  %v1897_v10 = vld [vmem:[#allocation5 + $0x68] ss:$24 sps:$4 sm:$0xff]   ;;  %v1901_v12 = vld [vmem:[#allocation5 + $0x64] ss:$24 sps:$4 sm:$0xff]   ;;  %v1903_v14 = vld [vmem:[#allocation5 + $0x98] ss:$24 sps:$4 sm:$0xff]  }
  0xa1   : > { %682 = vmatprep.subr.bf16.mxu0 %v1895_v8  ;;  %v1904_v13 = vld [vmem:[#allocation5 + $0x60] ss:$24 sps:$4 sm:$0xff]   ;;  %v1907_v15 = vld [vmem:[#allocation5 + $0x94] ss:$24 sps:$4 sm:$0xff]   ;;  %v1910_v18 = vld [vmem:[#allocation5 + $0x90] ss:$24 sps:$4 sm:$0xff]  }
  0xa2   : > { %v1905_v16 = vld [vmem:[#allocation5 + $0xcc] ss:$24 sps:$4 sm:$0xff]   ;;  %v1909_v17 = vld [vmem:[#allocation5 + $0xc8] ss:$24 sps:$4 sm:$0xff]   ;;  %v1911_v20 = vld [vmem:[#allocation5 + $0xfc] ss:$24 sps:$4 sm:$0xff]  }
  0xa3   : > { %724 = vmatpush1.bf16.msra.mxu1 %v1891_v5  ;;  %v1913_v19 = vld [vmem:[#allocation5 + $0xc4] ss:$24 sps:$4 sm:$0xff]   ;;  %v1916_v21 = vld [vmem:[#allocation5 + $0xc0] ss:$24 sps:$4 sm:$0xff]   ;;  %v1919_v23 = vld [vmem:[#allocation5 + $0xf4] ss:$24 sps:$4 sm:$0xff]  }
  0xa4   : > { %725 = vmatprep.subr.bf16.mxu1 %v1893_v7  ;;  %683 = vmatpush1.bf16.msra.mxu0 %v1898_v9  ;;  %v1915_v22 = vld [vmem:[#allocation5 + $0xf8] ss:$24 sps:$4 sm:$0xff]   ;;  %v1917_v24 = vld [vmem:[#allocation5 + $0x12c] ss:$24 sps:$4 sm:$0xff]   ;;  %v1921_v25 = vld [vmem:[#allocation5 + $0x128] ss:$24 sps:$4 sm:$0xff]  }
  0xa5   : > { %684 = vmatprep.subr.bf16.mxu0 %v1901_v12  ;;  %v1922_v26 = vld [vmem:[#allocation5 + $0xf0] ss:$24 sps:$4 sm:$0xff]   ;;  %v1925_v27 = vld [vmem:[#allocation5 + $0x124] ss:$24 sps:$4 sm:$0xff]   ;;  %v1928_v29 = vld [vmem:[#allocation5 + $0x120] ss:$24 sps:$4 sm:$0xff]  }
  0xa6   : > { %v1923_v28 = vld [vmem:[#allocation5 + $0x15c] ss:$24 sps:$4 sm:$0xff]   ;;  %v1927_v30 = vld [vmem:[#allocation5 + $0x158] ss:$24 sps:$4 sm:$0xff]   ;;  %v2228_v35 = vmov 0.0   ;;  %vm2229_vm0 = vmmov 0  }
  0xa7   : > { %726 = vmatpush1.bf16.msra.mxu1 %v1897_v10  ;;  %v1929_v32 = vld [vmem:[#allocation5 + $0x154] ss:$24 sps:$4 sm:$0xff]   ;;  %v1931_v33 = vld [vmem:[#allocation5 + $0x150] ss:$24 sps:$4 sm:$0xff]   ;;  %v2527_v37 = vshrl.u32 %v354_v36, 7  ;;  %v2550_v7 = vand.u32 127, %v354_v36 }
  0xa8   : > { %727 = vmatprep.subr.bf16.mxu1 %v1899_v11  ;;  %685 = vmatpush1.bf16.msra.mxu0 %v1904_v13  ;;  %v2533_v39 = vld [vmem:[%s2693_s2] sm:$0x3f]  ;;  %v1937_v57 = vld [vmem:[#allocation5 + $0x44] ss:$24 sps:$4 sm:$0xff]   ;;  %v1935_v58 = vld [vmem:[#allocation5 + $0x40] ss:$24 sps:$4 sm:$0xff]  }
  0xa9   : > { %686 = vmatprep.subr.bf16.mxu0 %v1907_v15  ;;  %v420_v38 = vsub.s32 2, %v2527_v37  ;;  %v412_v40 = vsub.s32 0, %v2527_v37  ;;  %v1932_v55 = vld [vmem:[#allocation5 + $0x10] ss:$24 sps:$4 sm:$0xff]   ;;  %v1934_v56 = vld [vmem:[#allocation5 + $0x14] ss:$24 sps:$4 sm:$0xff]   ;;  %vm811_vm1 = vcmp.gt.s32.totalorder %v2550_v7, %v2527_v37 }
  0xaa   : > { %v1940_v59 = vld [vmem:[#allocation5 + $0x74] ss:$24 sps:$4 sm:$0xff]   ;;  %v1938_v60 = vld [vmem:[#allocation5 + $0x70] ss:$24 sps:$4 sm:$0xff]   ;;  %v1943_v61 = vld [vmem:[#allocation5 + $0xa4] ss:$24 sps:$4 sm:$0xff]  }
  0xab   : > { %728 = vmatpush1.bf16.msra.mxu1 %v1903_v14  ;;  %v421_v41 = vrot.slane %v2533_v39, %v420_v38  ;;  %v413_v43 = vrot.slane %v2533_v39, %v412_v40  ;;  %v1941_v62 = vld [vmem:[#allocation5 + $0xa0] ss:$24 sps:$4 sm:$0xff]   ;;  %v1946_v63 = vld [vmem:[#allocation5 + $0xd4] ss:$24 sps:$4 sm:$0xff]   ;;  %v1949_v1 = vld [vmem:[#allocation5 + $0x104] ss:$24 sps:$4 sm:$0xff]  }
  0xac   : > { %729 = vmatprep.subr.bf16.mxu1 %v1905_v16  ;;  %687 = vmatpush1.bf16.msra.mxu0 %v1910_v18  ;;  %v1947_v2 = vld [vmem:[#allocation5 + $0x100] ss:$24 sps:$4 sm:$0xff]   ;;  %v1952_v3 = vld [vmem:[#allocation5 + $0x134] ss:$24 sps:$4 sm:$0xff]   ;;  %v1950_v4 = vld [vmem:[#allocation5 + $0x130] ss:$24 sps:$4 sm:$0xff]  }
  0xad   : > { %688 = vmatprep.subr.bf16.mxu0 %v1913_v19  ;;  %v1955_v5 = vld [vmem:[#allocation5 + $0x164] ss:$24 sps:$4 sm:$0xff]   ;;  %v1953_v6 = vld [vmem:[#allocation5 + $0x160] ss:$24 sps:$4 sm:$0xff]   ;;  %v812_v8 = vsel %vm811_vm1, -1e+30, %v2228_v35 }
  0xae   : > { %vm853_vm2 = vcmask 64512   ;;  %v428_v15 = vsub.s32 4, %v2527_v37  ;;  %v432_v16 = vsub.s32 5, %v2527_v37  ;;  %vm869_vm3 = vcmask 1043456   ;;  %s1675_s9 = sshll.u32 %s2292_s30, 7  ;;  %s351_s29 = scalar_lea.vmem [#allocation11], %s1585_s18 }
  0xaf   : > { %730 = vmatpush1.bf16.msra.mxu1 %v1909_v17  ;;  %vm356_vm4 = vcmp.lt.s32.totalorder %v2550_v7, 32  ;;  %v1977_v7 = vld [vmem:[#allocation8 + $0x28] sm:$0xff]   ;;  %s1467_s23 = sshll.u32 %s351_s29, 4  ;;  %s2647_s17 = scalar_lea.hbm %s2698_s7, %s1675_s9  ;;  %s2649_s23 = int_to_ptr.vmem [resolvable:$true] %s1467_s23 }
  0xb0   : > { %731 = vmatprep.subr.bf16.mxu1 %v1911_v20  ;;  %689 = vmatpush1.bf16.msra.mxu0 %v1916_v21  ;;  %v429_v17 = vrot.slane %v2533_v39, %v428_v15  ;;  %v433_v18 = vrot.slane %v2533_v39, %v432_v16  ;;  %s1454_s14 = scalar_lea.sflag [#allocation4], %s2492_s28  ;;  %s2142_s20 = scalar_lea.vmem %s2649_s23, 128 }
  0xb1   : > { %690 = vmatprep.subr.bf16.mxu0 %v1919_v23  ;;  %p2143_p6 = scmp.ne.s32.totalorder %s2649_s23, %s2142_s20  ;;  %p2716_p0 = scmp.ne.s32.totalorder %s2708_s10, 0 }
  0xb2   : > { %s2230_s30 = smov [#allocation11]  }
  0xb3   : > { %732 = vmatpush1.bf16.msra.mxu1 %v1915_v22  ;;  %p2144_p2 = pnand %p2143_p6, %p2716_p0  ;;  %s2146_s18 = sshll.u32 %s2230_s30, 4  ;;  %s2147_s18 = int_to_ptr.vmem [resolvable:$false] %s2146_s18 }
  0xb4   : > { %733 = vmatprep.subr.bf16.mxu1 %v1917_v24  ;;  %691 = vmatpush1.bf16.msra.mxu0 %v1922_v26  ;;  %s2148_s8 = scalar_lea.vmem %s2147_s18, 256  ;;  %p2149_p10 = scmp.lt.s32.totalorder %s2649_s23, %s2147_s18 }
  0xb5   : > { %692 = vmatprep.subr.bf16.mxu0 %v1925_v27  ;;  %p2145_p5 = pneg %p2144_p2  ;;  %p2150_p1 = scmp.lt.s32.totalorder %s2148_s8, %s2142_s20 }
  0xb7   : > { %734 = vmatpush1.bf16.msra.mxu1 %v1921_v25  ;;  %p2151_p11 = por %p2150_p1, %p2149_p10 }
  0xb8   : > { %735 = vmatprep.subr.bf16.mxu1 %v1923_v28  ;;  %693 = vmatpush1.bf16.msra.mxu0 %v1928_v29 }
  0xb9   : > { %694 = vmatprep.subr.bf16.mxu0 %v1929_v32  ;;  %p2152_p12 = pnand %p2151_p11, %p2145_p5 }
  0xbb   : > { %736 = vmatpush1.bf16.msra.mxu1 %v1927_v30 }
  0xbc   : > { %695 = vmatpush1.bf16.msra.mxu0 %v1931_v33  ;;  %1726 = vmatprep.subr.bf16.mxu1 %v2228_v35 }
  0xbd   : > { %762 = vmatprep.subr.bf16.mxu0 %v1934_v56 }
  0xbe   : > { %754 = vmatmul.mubr.bf16.vlgmr.msra.gmra.mrb[0].mxu1 %v2519_v34 }
  0xbf   : > { %713 = vmatmul.mubr.bf16.vlgmr.msra.gmra.mrb[0].mxu0 %v2519_v34  ;;  %1728 = vmatprep.mubr.msk.bf16.mxu1 %vm2229_vm0, %v2228_v35 }
  0xc0   : > { %794 = vmatprep.mubr.bf16.mxu0 %v2227_v0  ;;  %763 = vmatpush1.bf16.msra.mxu0 %v1932_v55  ;;  %v1944_v0 = vld [vmem:[#allocation5 + $0xd0] ss:$24 sps:$4 sm:$0xff]  }
  0xc1   : > { %764 = vmatprep.subr.bf16.mxu0 %v1937_v57 }
  0xc4   : > { %765 = vmatpush1.bf16.msra.mxu0 %v1935_v58 }
  0xc5   : > { %766 = vmatprep.subr.bf16.mxu0 %v1940_v59 }
  0xc8   : > { %767 = vmatpush1.bf16.msra.mxu0 %v1938_v60 }
  0xc9   : > { %768 = vmatprep.subr.bf16.mxu0 %v1943_v61 }
  0xcc   : > { %769 = vmatpush1.bf16.msra.mxu0 %v1941_v62 }
  0xcd   : > { %770 = vmatprep.subr.bf16.mxu0 %v1946_v63 }
  0xd0   : > { %771 = vmatpush1.bf16.msra.mxu0 %v1944_v0 }
  0xd1   : > { %772 = vmatprep.subr.bf16.mxu0 %v1949_v1 }
  0xd4   : > { %773 = vmatpush1.bf16.msra.mxu0 %v1947_v2  ;;  %v1956_v2 = vld [vmem:[#allocation7 + $0x40] sm:$0xff]  }
  0xd5   : > { %774 = vmatprep.subr.bf16.mxu0 %v1952_v3  ;;  %v1957_v3 = vld [vmem:[#allocation7] sm:$0xff]  }
  0xd8   : > { %775 = vmatpush1.bf16.msra.mxu0 %v1950_v4  ;;  %v1958_v4 = vld [vmem:[#allocation7 + $0x48] sm:$0xff]  }
  0xd9   : > { %776 = vmatprep.subr.bf16.mxu0 %v1955_v5  ;;  %v1959_v5 = vld [vmem:[#allocation7 + $0x8] sm:$0xff]  }
  0xdc   : > { %777 = vmatpush1.bf16.msra.mxu0 %v1953_v6  ;;  %v1960_v6 = vld [vmem:[#allocation7 + $0x50] sm:$0xff]  }
  0xdd   : > { %1686 = vmatprep.subr.bf16.mxu0 %v1956_v2 }
  0xdf   : > { %795 = vmatmul.mubr.bf16.vlgmr.msra.gmra.mrb[4].mxu0 %v2519_v34 }
  0xe0   : > { %1687 = vmatpush3.bf16.msra.mxu0 %v1957_v3 }
  0xe1   : > { %1688 = vmatprep.subr.bf16.mxu0 %v1958_v4 }
  0xe4   : > { %1689 = vmatpush3.bf16.msra.mxu0 %v1959_v5 }
  0xe5   : > { %1690 = vmatprep.subr.bf16.mxu0 %v1960_v6 }
 0x191   : > { %v755_v42 = vpop.f32.mrb[0].mxu1 }
 0x192   : > { %v756_v44 = vadd.f32 %v755_v42, %v421_v41  ;;  %v2542_v45 = vpop.f32.mrb[1].mxu1  ;;  %v714_v49 = vpop.f32.mrb[0].mxu0  ;;  %v424_v41 = vsub.s32 3, %v2527_v37 }
 0x193   : > { %v759_v46 = vpop.f32.mrb[2].mxu1  ;;  %v715_v50 = vadd.f32 %v714_v49, %v413_v43  ;;  %v2544_v51 = vpop.f32.mrb[1].mxu0  ;;  %v416_v43 = vsub.s32 1, %v2527_v37 }
 0x194   : > { %v805_v47 = vpack.c.bf16 %v756_v44, %v756_v44  ;;  %v760_v48 = vpop.f32.mrb[3].mxu1  ;;  %v718_v52 = vpop.f32.mrb[2].mxu0  ;;  %v425_v42 = vrot.slane %v2533_v39, %v424_v41 }
 0x195   : > { %v719_v53 = vpop.f32.mrb[3].mxu0  ;;  %v803_v54 = vpack.c.bf16 %v715_v50, %v715_v50  ;;  %v417_v48 = vrot.slane %v2533_v39, %v416_v43 }
 0x196   : > { %1727 = vmatpush3.bf16.xpose.msra.mxu1 %v805_v47  ;;  %v758_v46 = vadd.f32 %v2542_v45, %v425_v42 }
 0x197   : > { %1732 = vmatprep.subr.bf16.mxu1 %v2228_v35  ;;  %v717_v52 = vadd.f32 %v2544_v51, %v417_v48 }
 0x198   : > { %v806_v50 = vpack.c.bf16 %v758_v46, %v758_v46 }
 0x199   : > { %v804_v53 = vpack.c.bf16 %v717_v52, %v717_v52  ;;  %v1973_v52 = vld [vmem:[#allocation8 + $0x8] sm:$0xff]  }
 0x19d   : > { %1729 = vmatmul.mubr.bf16.vlgmr.msra.gmra.mrb[4].mxu1 %v803_v54 }
 0x19e   : > { %1734 = vmatprep.mubr.msk.bf16.mxu1 %vm2229_vm0, %v2228_v35 }
 0x1b2   : > { %v796_v19 = vpop.f32.mrb[4].mxu0 }
 0x1b3   : > { %v797_v20 = vadd.f32 %v796_v19, %v429_v17  ;;  %v798_v21 = vpop.f32.mrb[5].mxu0  ;;  %v1968_v17 = vld [vmem:[#allocation7 + $0x70] sm:$0xff]  }
 0x1b4   : > { %v799_v22 = vadd.f32 %v798_v21, %v433_v18  ;;  %v800_v23 = vpop.f32.mrb[6].mxu0  ;;  %v1969_v18 = vld [vmem:[#allocation7 + $0x30] sm:$0xff]  }
 0x1b5   : > { %v807_v24 = vpack.c.bf16 %v797_v20, %v797_v20  ;;  %v801_v25 = vpop.f32.mrb[7].mxu0  ;;  %v1970_v23 = vld [vmem:[#allocation7 + $0x78] sm:$0xff]  }
 0x1b6   : > { %v808_v26 = vpack.c.bf16 %v799_v22, %v799_v22 }
 0x1b7   : > { %v871_v27 = vsel %vm869_vm3, %v807_v24, 0  ;;  %v1971_v24 = vld [vmem:[#allocation7 + $0x38] sm:$0xff]  }
 0x1b8   : > { %v969_v28 = vsel %vm869_vm3, %v808_v26, 0  ;;  %1733 = vmatpush3.bf16.msra.mxu1 %v871_v27 }
 0x1b9   : > { %1738 = vmatprep.subr.bf16.mxu1 %v2228_v35 }
 0x270   : > { %v847_v9 = vpop.f32.mrb[4].mxu1 }
 0x271   : > { %v848_v10 = vadd.f32 %v847_v9, %v812_v8  ;;  %v1730_v11 = vpop.f32.mrb[5].mxu1  ;;  %v1962_v9 = vld [vmem:[#allocation7 + $0x58] sm:$0xff]  }
 0x272   : > { %v850_v12 = vpop.f32.mrb[6].mxu1  ;;  %v1964_v11 = vld [vmem:[#allocation7 + $0x60] sm:$0xff]  }
 0x273   : > { %v1731_v13 = vpop.f32.mrb[7].mxu1  ;;  %v854_v14 = vsel %vm853_vm2, %v848_v10, -inf  ;;  %v1965_v12 = vld [vmem:[#allocation7 + $0x20] sm:$0xff]  }
 0x274   : > { %855 = vmax.xlane.f32.xlu0 %v854_v14  ;;  %v1966_v13 = vld [vmem:[#allocation7 + $0x68] sm:$0xff]  }
 0x275   : > { %v1967_v14 = vld [vmem:[#allocation7 + $0x28] sm:$0xff]  }
 0x301   : > { %v856_v29 = vpop.xlane.xlu0 %855 }
 0x302   : > { %v857_v30 = vsub.f32 %v848_v10, %v856_v29  ;;  %v1963_v10 = vld [vmem:[#allocation7 + $0x18] sm:$0xff]  }
 0x304   : > { %v858_v32 = vmul.f32 1.442695, %v857_v30 }
 0x306   : > { %1988 = vpow2.f32 %v858_v32  ;;  %v2598_v32 = vld [vmem:[%s2697_s6] sm:$0xff] }
 0x307   : > { %v1203_v4 = vrot.slane %v2598_v32, %v416_v43  ;;  %v1208_v6 = vrot.slane %v2598_v32, %v420_v38  ;;  %v1230_v43 = vrot.slane %v2598_v32, %v424_v41 }
 0x310   : > { %v1989_v33 = vpop.eup %1988 }
 0x311   : > { %v860_v34 = vsel %vm853_vm2, %v1989_v33, 0.0 }
 0x312   : > { %861 = vadd.xlane.f32.xlu0 %v860_v34  ;;  %v1049_v34 = vrot.slane %v2598_v32, %v412_v40 }
 0x39f   : > { %v862_v36 = vpop.xlane.xlu0 %861 }
 0x3a0   : > { %1990 = vrcp.f32 %v862_v36 }
 0x3aa   : > { %v1991_v44 = vpop.eup %1990 }
 0x3ab   : > { %v864_v47 = vmul.f32 %v1991_v44, %v1989_v33 }
 0x3ad   : > { %v865_v49 = vpack.c.bf16 %v864_v47, %v864_v47 }
 0x3af   : > { %1735 = vmatmul.mubr.msk.bf16.vlgmr.msra.gmra.mrb[8].mxu1 %vm853_vm2, %v865_v49 }
 0x3b0   : > { %1739 = vmatpush3.bf16.xpose.msra.mxu1 %v806_v50  ;;  %1740 = vmatprep.mubr.msk.bf16.mxu1 %vm2229_vm0, %v2228_v35  ;;  %v1972_v50 = vld [vmem:[#allocation8] sm:$0xff]  }
 0x3b1   : > { %1744 = vmatprep.subr.bf16.mxu1 %v2228_v35 }
 0x3b7   : > { %1741 = vmatmul.mubr.bf16.vlgmr.msra.gmra.mrb[12].mxu1 %v804_v53 }
 0x3b8   : > { %1745 = vmatpush3.bf16.msra.mxu1 %v969_v28  ;;  %1746 = vmatprep.mubr.msk.bf16.mxu1 %vm2229_vm0, %v2228_v35 }
 0x3b9   : > { %1750 = vmatprep.subr.bf16.mxu1 %v2228_v35 }
 0x482   : > { %v2583_v39 = vpop.f32.mrb[8].mxu1 }
 0x483   : > { %v1736_v45 = vpop.f32.mrb[9].mxu1  ;;  %v1011_v28 = vpack.c.bf16 %v2583_v39, %v2583_v39  ;;  %v2608_v39 = vsel %vm356_vm4, 1.0, %v2228_v35 }
 0x484   : > { %v910_v54 = vpop.f32.mrb[10].mxu1 }
 0x485   : > { %v1737_v55 = vpop.f32.mrb[11].mxu1 }
 0x486   : > { %v1974_v55 = vld [vmem:[#allocation8 + $0x10] sm:$0xff]  }
 0x48a   : > { %v947_v56 = vpop.f32.mrb[12].mxu1 }
 0x48b   : > { %v948_v57 = vadd.f32 %v947_v56, %v812_v8  ;;  %v1742_v58 = vpop.f32.mrb[13].mxu1  ;;  %v1961_v8 = vld [vmem:[#allocation7 + $0x10] sm:$0xff]   ;;  %v1975_v56 = vld [vmem:[#allocation8 + $0x18] sm:$0xff]  }
 0x48c   : > { %v950_v59 = vpop.f32.mrb[14].mxu1  ;;  %1691 = vmatpush3.bf16.msra.mxu0 %v1961_v8  ;;  %v1978_v58 = vld [vmem:[#allocation8 + $0x30] sm:$0xff]  }
 0x48d   : > { %v1743_v51 = vpop.f32.mrb[15].mxu1  ;;  %v953_v60 = vsel %vm853_vm2, %v948_v57, -inf  ;;  %1692 = vmatprep.subr.bf16.mxu0 %v1962_v9  ;;  %v1979_v59 = vld [vmem:[#allocation8 + $0x38] sm:$0xff]  }
 0x48e   : > { %954 = vmax.xlane.f32.xlu1 %v953_v60  ;;  %v1980_v51 = vld [vmem:[#allocation10] sm:$0xff]   ;;  %v1981_v60 = vld [vmem:[#allocation10 + $0x8] sm:$0xff]  }
 0x490   : > { %1693 = vmatpush3.bf16.msra.mxu0 %v1963_v10 }
 0x491   : > { %1694 = vmatprep.subr.bf16.mxu0 %v1964_v11 }
 0x494   : > { %1695 = vmatpush3.bf16.msra.mxu0 %v1965_v12  ;;  %v1986_v12 = vld [vmem:[#allocation10 + $0x30] sm:$0xff]  }
 0x495   : > { %1696 = vmatprep.subr.bf16.mxu0 %v1966_v13  ;;  %v1987_v13 = vld [vmem:[#allocation10 + $0x38] sm:$0xff]  }
 0x498   : > { %1697 = vmatpush3.bf16.msra.mxu0 %v1967_v14 }
 0x499   : > { %1698 = vmatprep.subr.bf16.mxu0 %v1968_v17 }
 0x49c   : > { %1699 = vmatpush3.bf16.msra.mxu0 %v1969_v18 }
 0x49d   : > { %1700 = vmatprep.subr.bf16.mxu0 %v1970_v23 }
 0x4a0   : > { %1701 = vmatpush3.bf16.msra.mxu0 %v1971_v24 }
 0x4a1   : > { %1770 = vmatprep.subr.bf16.mxu0 %v2228_v35 }
 0x51b   : > { %v955_v61 = vpop.xlane.xlu1 %954 }
 0x51c   : > { %v956_v62 = vsub.f32 %v948_v57, %v955_v61  ;;  %v1976_v57 = vld [vmem:[#allocation8 + $0x20] sm:$0xff]   ;;  %v1982_v61 = vld [vmem:[#allocation10 + $0x10] sm:$0xff]  }
 0x51e   : > { %v957_v63 = vmul.f32 1.442695, %v956_v62  ;;  %v1983_v62 = vld [vmem:[#allocation10 + $0x18] sm:$0xff]  }
 0x520   : > { %1992 = vpow2.f32 %v957_v63  ;;  %v1984_v63 = vld [vmem:[#allocation10 + $0x20] sm:$0xff]  }
 0x52a   : > { %v1993_v0 = vpop.eup %1992 }
 0x52b   : > { %v959_v1 = vsel %vm853_vm2, %v1993_v0, 0.0 }
 0x52c   : > { %960 = vadd.xlane.f32.xlu1 %v959_v1 }
 0x5b9   : > { %v961_v19 = vpop.xlane.xlu1 %960 }
 0x5ba   : > { %1994 = vrcp.f32 %v961_v19 }
 0x5c4   : > { %v1995_v20 = vpop.eup %1994 }
 0x5c5   : > { %v963_v21 = vmul.f32 %v1995_v20, %v1993_v0  ;;  %v1985_v0 = vld [vmem:[#allocation10 + $0x28] sm:$0xff]  }
 0x5c7   : > { %v964_v22 = vpack.c.bf16 %v963_v21, %v963_v21 }
 0x5c9   : > { %1747 = vmatmul.mubr.msk.bf16.vlgmr.msra.gmra.mrb[16].mxu1 %vm853_vm2, %v964_v22  ;;  %v1340_v22 = vrot.slane %v2598_v32, %v428_v15 }
 0x5ca   : > { %1766 = vmatprep.mubr.msk.bf16.mxu1 %vm2229_vm0, %v2228_v35  ;;  %1751 = vmatpush3.bf16.msra.mxu1 %v1972_v50 }
 0x5cb   : > { %1752 = vmatprep.subr.bf16.mxu1 %v2228_v35 }
 0x5ce   : > { %1753 = vmatpush3.bf16.msra.mxu1 %v1973_v52 }
 0x5cf   : > { %1754 = vmatprep.subr.bf16.mxu1 %v2228_v35 }
 0x5d2   : > { %1755 = vmatpush3.bf16.msra.mxu1 %v1974_v55 }
 0x5d3   : > { %1756 = vmatprep.subr.bf16.mxu1 %v2228_v35 }
 0x5d6   : > { %1757 = vmatpush3.bf16.msra.mxu1 %v1975_v56 }
 0x5d7   : > { %1758 = vmatprep.subr.bf16.mxu1 %v2228_v35 }
 0x5da   : > { %1759 = vmatpush3.bf16.msra.mxu1 %v1976_v57 }
 0x5db   : > { %1760 = vmatprep.subr.bf16.mxu1 %v2228_v35 }
 0x5de   : > { %1761 = vmatpush3.bf16.msra.mxu1 %v1977_v7 }
 0x5df   : > { %1762 = vmatprep.subr.bf16.mxu1 %v2228_v35 }
 0x5e2   : > { %1763 = vmatpush3.bf16.msra.mxu1 %v1978_v58 }
 0x5e3   : > { %1764 = vmatprep.subr.bf16.mxu1 %v2228_v35 }
 0x5e6   : > { %1765 = vmatpush3.bf16.msra.mxu1 %v1979_v59 }
 0x69c   : > { %v1005_v25 = vpop.f32.mrb[16].mxu1 }
 0x69d   : > { %v1012_v26 = vpack.c.bf16 %v1005_v25, %v1005_v25  ;;  %v1748_v27 = vpop.f32.mrb[17].mxu1 }
 0x69e   : > { %v1008_v29 = vpop.f32.mrb[18].mxu1 }
 0x69f   : > { %v1749_v30 = vpop.f32.mrb[19].mxu1  ;;  %1178 = vmatprep.mubr.bf16.mxu0 %v1012_v26 }
 0x6a0   : > { %1179 = vmatmul.mubr.bf16.vlgmr.msra.gmra.mrb[8].mxu0 %v1011_v28 }
 0x6a1   : > { %1786 = vmatprep.mubr.msk.bf16.mxu0 %vm2229_vm0, %v2228_v35  ;;  %1771 = vmatpush3.bf16.msra.mxu0 %v1980_v51 }
 0x6a2   : > { %1772 = vmatprep.subr.bf16.mxu0 %v2228_v35 }
 0x6a5   : > { %1773 = vmatpush3.bf16.msra.mxu0 %v1981_v60 }
 0x6a6   : > { %1774 = vmatprep.subr.bf16.mxu0 %v2228_v35 }
 0x6a9   : > { %1775 = vmatpush3.bf16.msra.mxu0 %v1982_v61 }
 0x6aa   : > { %1776 = vmatprep.subr.bf16.mxu0 %v2228_v35 }
 0x6ad   : > { %1777 = vmatpush3.bf16.msra.mxu0 %v1983_v62 }
 0x6ae   : > { %1778 = vmatprep.subr.bf16.mxu0 %v2228_v35 }
 0x6b1   : > { %1779 = vmatpush3.bf16.msra.mxu0 %v1984_v63 }
 0x6b2   : > { %1780 = vmatprep.subr.bf16.mxu0 %v2228_v35 }
 0x6b5   : > { %1781 = vmatpush3.bf16.msra.mxu0 %v1985_v0 }
 0x6b6   : > { %1782 = vmatprep.subr.bf16.mxu0 %v2228_v35 }
 0x6b9   : > { %1783 = vmatpush3.bf16.msra.mxu0 %v1986_v12 }
 0x6ba   : > { %1784 = vmatprep.subr.bf16.mxu0 %v2228_v35 }
 0x6bd   : > { %1785 = vmatpush3.bf16.msra.mxu0 %v1987_v13 }
 0x773   : > { %v1702_v33 = vpop.f32.mrb[8].mxu0 }
 0x774   : > { %v1703_v36 = vpop.f32.mrb[9].mxu0 }
 0x775   : > { %v1704_v42 = vadd.f32 %v1703_v36, %v1702_v33  ;;  %v1705_v44 = vpop.f32.mrb[10].mxu0 }
 0x776   : > { %v1706_v46 = vpop.f32.mrb[11].mxu0  ;;  %v1445_v44 = vrot.slane %v2598_v32, %v432_v16 }
 0x777   : > { %v1181_v47 = vadd.f32 %v1704_v42, %v1049_v34  ;;  %v1449_v42 = vsub.s32 6, %v2527_v37 }
 0x779   : > { %v1186_v48 = vmax.f32 %v1181_v47, 0.0 }
 0x77b   : > { %v1187_v49 = vadd.f32 %v1186_v48, %v2515_v31  ;;  %v1450_v48 = vrot.slane %v2598_v32, %v1449_v42 }
 0x77d   : > { %1188 = vadd.xlane.f32.xlu0 %v1187_v49 }
 0x80a   : > { %v1189_v40 = vpop.xlane.xlu0 %1188 }
 0x80b   : > { %v1190_v53 = vmul.f32 0.03125, %v1189_v40 }
 0x80d   : > { %v1191_v45 = vsub.f32 %v1187_v49, %v1190_v53 }
 0x80f   : > { %v1192_v54 = vmul.f32 %v2608_v39, %v1191_v45 }
 0x811   : > { %v1193_v31 = vmul.f32 %v1192_v54, %v1192_v54 }
 0x813   : > { %1194 = vadd.xlane.f32.xlu1 %v1193_v31 }
 0x8a0   : > { %v1195_v1 = vpop.xlane.xlu1 %1194 }
 0x8a1   : > { %v1196_v2 = vmul.f32 0.03125, %v1195_v1 }
 0x8a3   : > { %v1197_v3 = vadd.f32 1e-05, %v1196_v2 }
 0x8a5   : > { %1996 = vrsqrt.f32 %v1197_v3 }
 0x8af   : > { %v1997_v5 = vpop.eup %1996 }
 0x8b0   : > { %v1199_v8 = vmul.f32 %v1997_v5, %v1192_v54 }
 0x8b2   : > { %v1204_v9 = vmul.f32 %v1203_v4, %v1199_v8 }
 0x8b4   : > { %v1209_v10 = vadd.f32 %v1208_v6, %v1204_v9 }
 0x8b6   : > { %v1210_v11 = vpack.c.bf16 %v1209_v10, %v1209_v10 }
 0x8b8   : > { %1767 = vmatmul.mubr.bf16.vlgmr.msra.gmra.mrb[20].mxu1 %v1210_v11 }
 0x98b   : > { %v1313_v14 = vpop.f32.mrb[20].mxu1 }
 0x98c   : > { %v1314_v17 = vadd.f32 %v1313_v14, %v1230_v43  ;;  %v1768_v18 = vpop.f32.mrb[21].mxu1 }
 0x98d   : > { %v1316_v19 = vpop.f32.mrb[22].mxu1 }
 0x98e   : > { %v1319_v38 = vmax.f32 %v1314_v17, 0.0  ;;  %v1769_v20 = vpop.f32.mrb[23].mxu1 }
 0x990   : > { %v1320_v21 = vpack.c.bf16 %v1319_v38, %v1319_v38 }
 0x992   : > { %1787 = vmatmul.mubr.bf16.vlgmr.msra.gmra.mrb[12].mxu0 %v1320_v21 }
 0xa65   : > { %v1423_v23 = vpop.f32.mrb[12].mxu0 }
 0xa66   : > { %v1424_v35 = vadd.f32 %v1423_v23, %v1340_v22  ;;  %v1788_v24 = vpop.f32.mrb[13].mxu0 }
 0xa67   : > { %v1426_v25 = vpop.f32.mrb[14].mxu0 }
 0xa68   : > { %v1789_v26 = vpop.f32.mrb[15].mxu0  ;;  %v1429_v27 = vadd.f32 %v1424_v35, %v1209_v10 }
 0xa6a   : > { %1430 = vadd.xlane.f32.xlu0 %v1429_v27 }
 0xaf7   : > { %v1431_v41 = vpop.xlane.xlu0 %1430 }
 0xaf8   : > { %v1432_v28 = vmul.f32 0.03125, %v1431_v41 }
 0xafa   : > { %v1433_v29 = vsub.f32 %v1429_v27, %v1432_v28 }
 0xafc   : > { %v1434_v30 = vmul.f32 %v2608_v39, %v1433_v29 }
 0xafe   : > { %v1435_v33 = vmul.f32 %v1434_v30, %v1434_v30 }
 0xb00   : > { %1436 = vadd.xlane.f32.xlu1 %v1435_v33 }
 0xb8d   : > { %v1437_v34 = vpop.xlane.xlu1 %1436 }
 0xb8e   : > { %v1438_v36 = vmul.f32 0.03125, %v1437_v34 }
 0xb90   : > { %v1439_v15 = vadd.f32 1e-05, %v1438_v36 }
 0xb92   : > { %1998 = vrsqrt.f32 %v1439_v15 }
 0xb9c   : > { %v1999_v46 = vpop.eup %1998 }
 0xb9d   : > { %v1441_v47 = vmul.f32 %v1999_v46, %v1434_v30 }
 0xb9f   : > { %v1446_v49 = vmul.f32 %v1445_v44, %v1441_v47 }
 0xba1   : > { %v1451_v50 = vadd.f32 %v1450_v48, %v1446_v49 }
 0xba3   : > { %1452 = vst [vmem:[%s351_s29] sm:$0xff] %v1451_v50 }
 0xba4   : > { %2155 = shalt.err (!%p2152_p12)
}
 0xba5   : > { %s2156_s28 = scalar_lea.hbm %s2647_s17, 128  ;;  %s2160_s11 = scalar_lea.hbm %s2698_s7, 256 }
 0xba6   : > { %p2157_p13 = scmp.ne.s32.totalorder %s2647_s17, %s2156_s28  ;;  %p2161_p9 = scmp.lt.u32.totalorder %s2647_s17, %s2698_s7 }
 0xba7   : > { %p2162_p4 = scmp.lt.u32.totalorder %s2160_s11, %s2156_s28  ;;  %p2164_p6 = scmp.lt.u32.totalorder %s2156_s28, %s2647_s17 }
 0xba8   : > { %p2158_p3 = pnand %p2157_p13, %p2716_p0 }
 0xba9   : > { %p2163_p8 = por %p2162_p4, %p2161_p9 }
 0xbaa   : > { %p2159_p7 = pneg %p2158_p3 }
 0xbab   : > { %p2165_p2 = por %p2164_p6, %p2163_p8 }
 0xbad   : > { %p2166_p5 = pnand %p2165_p2, %p2159_p7 }
 0xbaf   : > { %2169 = shalt.err (!%p2166_p5)
}
 0xbb0   : > { %1808 = dma.vmem_to_hbm [thread:$0]  (%p2716_p0), %s2649_s23, 128, %s2647_s17, %s1454_s14  }
 0xbb1 PF: > { %s1479_s21 = sand.u32 1, %s2204_s24   ;;  %p2717_p10 = scmp.ne.s32.totalorder %s2709_s15, 0 }
 0xbb2   : > { %p2718_p1 = scmp.ge.s32.totalorder %s2216_s27, 2  ;;  %s1480_s16 = scalar_lea.sflag [#allocation4], %s1479_s21 }
 0xbb4   : > { %p1828_p11 = pnand %p2718_p1, %p2717_p10 }
 0xbb6   : > { %2199 = dma.done.wait (!%p1828_p11), %s1480_s16, 128  }
 0xbb7   : > { %2201 = vsyncadd (!%p1828_p11), %s1480_s16, 4294967168  ;;  %p22_p12 = scmp.ge.s32.totalorder %s2416_s19, 4   ;;  %s2719_s24 = smov %s2208_s25 }
 0xbb8   : > { %s2720_s25 = smov %s2212_s26  ;;  %s2721_s26 = smov %s2427_s12 }
 0xbb9   : > { %s2722_s27 = smov %s2416_s19  ;;  %24 = sbr.rel (!%p22_p12) target bundleno = 7 (0x7), region = 109 }
 0xbc0   :  { %1485 = vsyncpa [#allocation3], 1 }
 0xbc1   :  { %1487 = vsyncpa [#allocation3 + $0x1], 1 }
 0xbc2   :  { %1488 = vsyncpa [#allocation6], 1 }
 0xbc3   :  { %1489 = vsyncpa [#allocation9], 1 }
 0xbc4   :  { %1490 = vsyncpa [#allocation4], 1 }
 0xbc5   :  { %1492 = vsyncpa [#allocation4 + $0x1], 1 }

</bundles_post_ra>
